<compile_context>
chip_gen: v6e
topology: v6e:2x2x1
jax: 0.10.0
libtpu: 0.0.40
codegen_flags: <defaults>
</compile_context>

<pallas_src>
import functools

import numpy as np
import jax
import jax.numpy as jnp
from jax import lax
from jax.experimental import pallas as pl
from jax.experimental.pallas import tpu as pltpu


_BLOCK_BUDGET_BYTES = 4 * 1024 * 1024   # per X block; ~4x with double-buffered in+out
_VMEM_LIMIT_BYTES = 32 * 1024 * 1024    # safe scoped-VMEM on v5e / v6e / v7x


# ---------------------------------------------------------------------------
# Stateless per-(example-id, channel) hash -> tied Bernoulli keep decision.
# Plain jnp integer ops so it lowers on both Mosaic and the interpreter, and is
# reused verbatim for the host-side reference in __main__.
def _tied_hash_u32(seed_u32, ch_u32):
    h = seed_u32 * jnp.uint32(0x85EBCA6B) + (ch_u32 + jnp.uint32(1)) * jnp.uint32(0xC2B2AE35)
    h = h ^ (h >> 16)
    h = h * jnp.uint32(0x7FEB352D)
    h = h ^ (h >> 15)
    h = h * jnp.uint32(0x846CA68B)
    h = h ^ (h >> 16)
    return h


# ---------------------------------------------------------------------------
# Kernels
def _train_kernel(idx_ref, x_ref, o_ref, *, n_fixed, thr):
    # idx_ref: (TB, 1, 1) int32, x_ref/o_ref: (TB, C, TD)
    tb, C, _ = x_ref.shape
    seeds = idx_ref[...].astype(jnp.uint32)                       # (TB, 1, 1)
    ch_i = lax.broadcasted_iota(jnp.int32, (tb, C, 1), 1)         # (TB, C, 1)
    ch_u = ch_i.astype(jnp.uint32)
    h = _tied_hash_u32(seeds, ch_u)                               # (TB, C, 1)
    keep = jnp.logical_or(ch_i < n_fixed, h < jnp.uint32(thr))    # (TB, C, 1)
    # (TB, C, 1) mask broadcasts over the lane (D) axis; never materialize (C, D).
    o_ref[...] = (x_ref[...] * keep.astype(x_ref.dtype)).astype(o_ref.dtype)


def _eval_kernel(x_ref, o_ref, *, n_fixed, scale):
    # x_ref: (TB, n_head, D) -- only the kept head channels are DMA'd from HBM.
    # o_ref: (TB, C, D)
    tb, n_head, D = x_ref.shape
    C = o_ref.shape[1]
    ch = lax.broadcasted_iota(jnp.int32, (n_head, 1), 0)
    head_scale = jnp.where(ch < n_fixed,
                           jnp.asarray(scale, x_ref.dtype),
                           jnp.asarray(0, x_ref.dtype))           # (n_head, 1)
    o_ref[:, :n_head, :] = (x_ref[...] * head_scale).astype(o_ref.dtype)
    if n_head < C:  # static Python branch; tail never read from HBM
        o_ref[:, n_head:, :] = jnp.zeros((tb, C - n_head, D), o_ref.dtype)


# ---------------------------------------------------------------------------
# Wrapper
def _round_up(x, m):
    return (x + m - 1) // m * m


def _largest_divisor_leq(n, cap):
    cap = max(1, min(n, cap))
    for d in range(cap, 0, -1):
        if n % d == 0:
            return d
    return 1


def tied_dropout(X, idx, *, p_fixed=0.2, p_mem=0.1, drop_mode="train",
                 data_len=100000):
    if p_fixed == 1:
        return X
    B, C, D = X.shape
    n_fixed = int(p_fixed * C)                 # matches PyTorch int() truncation
    itemsize = jnp.dtype(X.dtype).itemsize

    if drop_mode == "train":
        # TODO(synk): the PyTorch module raises on idx >= data_len; doing this
        # with a device->host bool() blocks dispatch and breaks under jit, so it
        # is only performed for concrete (non-traced) idx.
        if not isinstance(idx, jax.core.Tracer):
            if bool(np.any(np.asarray(idx) >= data_len)):
                raise RuntimeError(
                    f"Example Index {idx} is invalid, expected idx < {data_len}")

        thr = min(int(p_mem * (1 << 32)), (1 << 32) - 1)

        # Tile selection: pack as many examples per step as fit the VMEM budget;
        # tile the lane (D) axis only if one example's (C, D) slab is too big.
        # C is never tiled: the mask is a per-channel function of the example id.
        tb = _largest_divisor_leq(B, max(1, _BLOCK_BUDGET_BYTES // (C * D * itemsize)))
        td = D
        if tb == 1 and C * D * itemsize > _BLOCK_BUDGET_BYTES and D % 128 == 0:
            td = 128
            while D % (td * 2) == 0 and C * (td * 2) * itemsize <= _BLOCK_BUDGET_BYTES:
                td *= 2

        kernel = functools.partial(_train_kernel, n_fixed=n_fixed, thr=thr)
        idx3 = idx.astype(jnp.int32).reshape(B, 1, 1)
        return pl.pallas_call(
            kernel,
            out_shape=jax.ShapeDtypeStruct(X.shape, X.dtype),
            grid=(B // tb, D // td),
            in_specs=[
                pl.BlockSpec((tb, 1, 1), lambda b, d: (b, 0, 0)),
                pl.BlockSpec((tb, C, td), lambda b, d: (b, 0, d)),
            ],
            out_specs=pl.BlockSpec((tb, C, td), lambda b, d: (b, 0, d)),
            compiler_params=pltpu.CompilerParams(
                dimension_semantics=("parallel", "parallel"),
                vmem_limit_bytes=_VMEM_LIMIT_BYTES),
        )(idx3, X)

    else:
        scale = (p_fixed + p_mem) / p_fixed
        # Only DMA the kept head channels (rounded up to the sublane size 8).
        n_head = C
        if 0 < n_fixed < C and _round_up(n_fixed, 8) <= C:
            n_head = _round_up(n_fixed, 8)
        tb = _largest_divisor_leq(B, max(1, _BLOCK_BUDGET_BYTES // (C * D * itemsize)))
        kernel = functools.partial(_eval_kernel, n_fixed=n_fixed, scale=scale)
        return pl.pallas_call(
            kernel,
            out_shape=jax.ShapeDtypeStruct(X.shape, X.dtype),
            grid=(B // tb,),
            in_specs=[pl.BlockSpec((tb, n_head, D), lambda b: (b, 0, 0))],
            out_specs=pl.BlockSpec((tb, C, D), lambda b: (b, 0, 0)),
            compiler_params=pltpu.CompilerParams(
                dimension_semantics=("parallel",),
                vmem_limit_bytes=_VMEM_LIMIT_BYTES),
        )(X)


# ---------------------------------------------------------------------------
# Pure-JAX reference with identical tied-mask semantics (same hash).
def _reference_train(X, idx, p_fixed, p_mem):
    B, C, D = X.shape
    n_fixed = int(p_fixed * C)
    thr = jnp.uint32(min(int(p_mem * (1 << 32)), (1 << 32) - 1))
    ch = jnp.arange(C, dtype=jnp.uint32)[None, :]
    seeds = idx.astype(jnp.uint32)[:, None]
    h = _tied_hash_u32(seeds, ch)
    keep = jnp.logical_or(jnp.arange(C)[None, :] < n_fixed, h < thr)
    return X * keep.astype(X.dtype)[:, :, None]


if __name__ == "__main__":
    key = jax.random.PRNGKey(0)
    B, C, D = 4, 16, 256
    p_fixed, p_mem = 0.2, 0.1
    n_fixed = int(p_fixed * C)  # = 3

    X = jax.random.normal(key, (B, C, D), dtype=jnp.float32)
    idx = jnp.array([7, 42, 7, 99999], dtype=jnp.int32)  # examples 0 and 2 share an id

    # Training-mode tied dropout.
    y_train = tied_dropout(X, idx, p_fixed=p_fixed, p_mem=p_mem, drop_mode="train")
    jax.block_until_ready(y_train)

    # Eval-mode path.
    y_eval = tied_dropout(X, idx, p_fixed=p_fixed, p_mem=p_mem, drop_mode="eval")
    jax.block_until_ready(y_eval)

    # Exact match against the pure-JAX reference of the same tied semantics.
    assert jnp.allclose(y_train, _reference_train(X, idx, p_fixed, p_mem))
    # Fixed channels untouched in training mode.
    assert jnp.allclose(y_train[:, :n_fixed], X[:, :n_fixed])
    # Remaining channels either kept verbatim or fully zeroed (per channel).
    rest_ratio = jnp.where(X[:, n_fixed:] != 0, y_train[:, n_fixed:] / X[:, n_fixed:], 0.0)
    assert bool(jnp.all((jnp.abs(rest_ratio) < 1e-6) | (jnp.abs(rest_ratio - 1.0) < 1e-6)))
    # Tied: examples sharing the same idx get identical per-channel masks.
    kept0 = jnp.any(y_train[0] != 0, axis=-1)
    kept2 = jnp.any(y_train[2] != 0, axis=-1)
    assert bool(jnp.all(kept0 == kept2))
    # Deterministic across calls.
    y_train2 = tied_dropout(X, idx, p_fixed=p_fixed, p_mem=p_mem, drop_mode="train")
    assert jnp.allclose(y_train, jax.block_until_ready(y_train2))
    # Eval: head scaled, tail zeroed.
    scale = (p_fixed + p_mem) / p_fixed
    assert jnp.allclose(y_eval[:, :n_fixed], X[:, :n_fixed] * scale, rtol=1e-6, atol=1e-6)
    assert jnp.allclose(y_eval[:, n_fixed:], 0.0)

    print("KERNEL_OK")
</pallas_src>

<mosaic_0001>
module attributes {stable_mosaic.version = 11 : i64} {
  func.func @_train_kernel(%arg0: i32, %arg1: i32, %arg2: memref<4x1x1xi32, #tpu.memory_space<vmem>>, %arg3: memref<4x16x256xf32, #tpu.memory_space<vmem>>, %arg4: memref<4x16x256xf32, #tpu.memory_space<vmem>>) attributes {dimension_semantics = [#tpu.dimension_semantics<parallel>, #tpu.dimension_semantics<parallel>], iteration_bounds = array<i64: 1, 1>, scalar_prefetch = 0 : i64, scratch_operands = 0 : i64, tpu.core_type = #tpu.core_type<tc>, window_params = [{transform_indices = @transform_0, window_bounds = array<i64: 4, 1, 1>}, {transform_indices = @transform_1, window_bounds = array<i64: 4, 16, 256>}, {transform_indices = @transform_2, window_bounds = array<i64: 4, 16, 256>}]} {
    %c0 = arith.constant 0 : index
    %c0_0 = arith.constant 0 : index
    %c0_1 = arith.constant 0 : index
    %0 = vector.load %arg2[%c0, %c0_0, %c0_1] : memref<4x1x1xi32, #tpu.memory_space<vmem>>, vector<4x1x1xi32>
    %1 = tpu.iota {dimensions = array<i32: 1>} : vector<4x16x1xi32>
    %c-2048144789_i32 = arith.constant -2048144789 : i32
    %2 = vector.broadcast %c-2048144789_i32 : i32 to vector<4x1x1xi32>
    %3 = arith.muli %0, %2 : vector<4x1x1xi32>
    %c1_i32 = arith.constant 1 : i32
    %4 = vector.broadcast %c1_i32 : i32 to vector<4x16x1xi32>
    %5 = arith.addi %1, %4 : vector<4x16x1xi32>
    %c-1028477387_i32 = arith.constant -1028477387 : i32
    %6 = vector.broadcast %c-1028477387_i32 : i32 to vector<4x16x1xi32>
    %7 = arith.muli %5, %6 : vector<4x16x1xi32>
    %8 = vector.broadcast %3 : vector<4x1x1xi32> to vector<4x16x1xi32>
    %9 = arith.addi %8, %7 : vector<4x16x1xi32>
    %c16_i32 = arith.constant 16 : i32
    %10 = vector.broadcast %c16_i32 : i32 to vector<4x16x1xi32>
    %11 = arith.shrui %9, %10 : vector<4x16x1xi32>
    %12 = arith.xori %9, %11 : vector<4x16x1xi32>
    %c2146121005_i32 = arith.constant 2146121005 : i32
    %13 = vector.broadcast %c2146121005_i32 : i32 to vector<4x16x1xi32>
    %14 = arith.muli %12, %13 : vector<4x16x1xi32>
    %c15_i32 = arith.constant 15 : i32
    %15 = vector.broadcast %c15_i32 : i32 to vector<4x16x1xi32>
    %16 = arith.shrui %14, %15 : vector<4x16x1xi32>
    %17 = arith.xori %14, %16 : vector<4x16x1xi32>
    %c-2073254261_i32 = arith.constant -2073254261 : i32
    %18 = vector.broadcast %c-2073254261_i32 : i32 to vector<4x16x1xi32>
    %19 = arith.muli %17, %18 : vector<4x16x1xi32>
    %c16_i32_2 = arith.constant 16 : i32
    %20 = vector.broadcast %c16_i32_2 : i32 to vector<4x16x1xi32>
    %21 = arith.shrui %19, %20 : vector<4x16x1xi32>
    %22 = arith.xori %19, %21 : vector<4x16x1xi32>
    %c3_i32 = arith.constant 3 : i32
    %23 = vector.broadcast %c3_i32 : i32 to vector<4x16x1xi32>
    %24 = arith.cmpi slt, %1, %23 : vector<4x16x1xi32>
    %c429496729_i32 = arith.constant 429496729 : i32
    %25 = vector.broadcast %c429496729_i32 : i32 to vector<4x16x1xi32>
    %26 = arith.cmpi ult, %22, %25 : vector<4x16x1xi32>
    %27 = arith.ori %24, %26 : vector<4x16x1xi1>
    %c0_3 = arith.constant 0 : index
    %c0_4 = arith.constant 0 : index
    %c0_5 = arith.constant 0 : index
    %28 = vector.load %arg3[%c0_3, %c0_4, %c0_5] : memref<4x16x256xf32, #tpu.memory_space<vmem>>, vector<4x16x256xf32>
    %29 = arith.extui %27 : vector<4x16x1xi1> to vector<4x16x1xi32>
    %30 = arith.sitofp %29 : vector<4x16x1xi32> to vector<4x16x1xf32>
    %31 = vector.broadcast %30 : vector<4x16x1xf32> to vector<4x16x256xf32>
    %32 = arith.mulf %28, %31 : vector<4x16x256xf32>
    %c0_6 = arith.constant 0 : index
    %c0_7 = arith.constant 0 : index
    %c0_8 = arith.constant 0 : index
    %33 = vector.load %arg4[%c0_6, %c0_7, %c0_8] : memref<4x16x256xf32, #tpu.memory_space<vmem>>, vector<4x16x256xf32>
    tpu.vector_store %arg4[%c0_6, %c0_7, %c0_8], %32 {strides = array<i32>} : memref<4x16x256xf32, #tpu.memory_space<vmem>>, vector<4x16x256xf32>,
    return
  }
  func.func @transform_0(%arg0: i32, %arg1: i32) -> (i32, i32, i32) {
    %c0_i32 = arith.constant 0 : i32
    %c0_i32_0 = arith.constant 0 : i32
    %c0_i32_1 = arith.constant 0 : i32
    return %arg0, %c0_i32, %c0_i32_0 : i32, i32, i32
  }
  func.func @transform_1(%arg0: i32, %arg1: i32) -> (i32, i32, i32) {
    %c0_i32 = arith.constant 0 : i32
    %c0_i32_0 = arith.constant 0 : i32
    return %arg0, %c0_i32, %arg1 : i32, i32, i32
  }
  func.func @transform_2(%arg0: i32, %arg1: i32) -> (i32, i32, i32) {
    %c0_i32 = arith.constant 0 : i32
    %c0_i32_0 = arith.constant 0 : i32
    return %arg0, %c0_i32, %arg1 : i32, i32, i32
  }
}

</mosaic_0001>

<bundles_post_ra>
// kernel: tpu_custom_call.1
= control target key start
LH: loop header
LB: loop body
LE: loop exit
PB: predicated region body
PF: predicated region fallthrough
CT: control target
= control target key end

     0   :  { %7 = vsyncpa [#allocation3], 0  ;;  %s407_s0 = inlined_call_operand.vmem [shape: s32[4,1,1], index: 0, kind: input, shape index: {}]   ;;  %s408_s1 = inlined_call_operand.hbm [shape: f32[4,16,256], index: 1, kind: input, shape index: {}]   ;;  %s409_s2 = inlined_call_operand.hbm [shape: f32[4,16,256], index: 2, kind: output, shape index: {}]  }
   0x1   :  { %8 = vsyncpa [#allocation4], 0  ;;  %s348_s9 = smov [#allocation2]  }
   0x2   :  { %s16_s10 = sshll.u32 %s348_s9, 4  ;;  %s17_s10 = int_to_ptr.vmem [resolvable:$true] %s16_s10 }
   0x3   :  { %s312_s11 = scalar_lea.vmem %s17_s10, 2048  ;;  %p317_p1 = scmp.lt.s32.totalorder %s17_s10, %s17_s10 }
   0x4   :  { %p313_p0 = scmp.ne.s32.totalorder %s17_s10, %s312_s11  ;;  %p318_p2 = scmp.lt.s32.totalorder %s312_s11, %s312_s11 }
   0x6   :  { %p319_p3 = por %p318_p2, %p317_p1 }
   0x8   :  { %p320_p4 = pnand %p319_p3, %p313_p0 }
   0xa   :  { %323 = shalt.err (!%p320_p4)
}
   0xb   :  { %s349_s12 = smov 256   ;;  %s350_s13 = smov 16  }
   0xc   :  { %22 = dma.hbm_to_vmem [thread:$0]  %s408_s1, 2048, %s17_s10, [#allocation3], %s349_s12, %s349_s12, %s350_s13  }
   0xd   :  { %344 = dma.done.wait [#allocation3], 2048  }
   0xe   :  { %345 = vsyncadd [#allocation3], 4294965248  ;;  %v30_v0 = vlaneseq  ;;  %v351_v1 = vmov 0   ;;  %v28_v8 = vld [vmem:[%s407_s0 + $0x2] sm:$0x1] }
   0xf   :  { %293 = vset.pattern.permute.xlu1 %v351_v1  ;;  %282 = vset.pattern.permute.xlu0 %v351_v1  ;;  %v26_v9 = vld [vmem:[%s407_s0] sm:$0x1]  ;;  %v29_v10 = vld [vmem:[%s407_s0 + $0x3] sm:$0x1]  ;;  %v35_v11 = vmul.u32 2246822507, %v28_v8 }
  0x10   :  { %v375_v2 = vshrl.u32 %v30_v0, 7  ;;  %v27_v13 = vld [vmem:[%s407_s0 + $0x1] sm:$0x1]  ;;  %v33_v14 = vmul.u32 2246822507, %v26_v9  ;;  %s353_s0 = smov [#allocation5]  }
  0x11   :  { %v36_v15 = vmul.u32 2246822507, %v29_v10  ;;  %v34_v17 = vmul.u32 2246822507, %v27_v13  ;;  %s256_s23 = sshll.u32 %s353_s0, 4  ;;  %s257_s23 = int_to_ptr.vmem [resolvable:$true] %s256_s23 }
  0x12   :  { %v32_v3 = vadd.s32 8, %v375_v2  ;;  %v37_v4 = vadd.s32 1, %v375_v2  ;;  %v43_v7 = vsub.s32 0, %v375_v2  ;;  %vm129_vm0 = vcmp.lt.s32.totalorder %v375_v2, 3  ;;  %s324_s24 = scalar_lea.vmem %s257_s23, 2048  ;;  %p329_p6 = scmp.lt.s32.totalorder %s257_s23, %s257_s23 }
  0x13   :  { %p325_p5 = scmp.ne.s32.totalorder %s257_s23, %s324_s24  ;;  %p330_p7 = scmp.lt.s32.totalorder %s324_s24, %s324_s24 }
  0x14   :  { %v38_v5 = vadd.s32 1, %v32_v3  ;;  %v39_v6 = vmul.u32 3266489909, %v37_v4  ;;  %v52_v16 = vrot.slane %v35_v11, %v43_v7  ;;  %v44_v18 = vrot.slane %v33_v14, %v43_v7 }
  0x15   :  { %v56_v19 = vrot.slane %v36_v15, %v43_v7  ;;  %v48_v22 = vrot.slane %v34_v17, %v43_v7  ;;  %p331_p8 = por %p330_p7, %p329_p6 }
  0x16   :  { %v40_v12 = vmul.u32 3266489909, %v38_v5  ;;  %v61_v20 = vadd.s32 %v52_v16, %v39_v6  ;;  %v57_v23 = vadd.s32 %v44_v18, %v39_v6 }
  0x17   :  { %v63_v25 = vadd.s32 %v56_v19, %v39_v6  ;;  %v59_v29 = vadd.s32 %v48_v22, %v39_v6  ;;  %p332_p9 = pnand %p331_p8, %p325_p5 }
  0x18   :  { %v62_v21 = vadd.s32 %v52_v16, %v40_v12  ;;  %v58_v24 = vadd.s32 %v44_v18, %v40_v12  ;;  %v64_v26 = vadd.s32 %v56_v19, %v40_v12  ;;  %v69_v27 = vshrl.u32 %v61_v20, 16 }
  0x19   :  { %v60_v30 = vadd.s32 %v48_v22, %v40_v12  ;;  %v65_v31 = vshrl.u32 %v57_v23, 16  ;;  %v71_v33 = vshrl.u32 %v63_v25, 16  ;;  %v67_v37 = vshrl.u32 %v59_v29, 16 }
  0x1a   :  { %v70_v28 = vshrl.u32 %v62_v21, 16  ;;  %v66_v32 = vshrl.u32 %v58_v24, 16  ;;  %v72_v34 = vshrl.u32 %v64_v26, 16  ;;  %v77_v35 = vxor.u32 %v69_v27, %v61_v20 }
  0x1b   :  { %v68_v38 = vshrl.u32 %v60_v30, 16  ;;  %v73_v39 = vxor.u32 %v65_v31, %v57_v23  ;;  %v79_v41 = vxor.u32 %v71_v33, %v63_v25  ;;  %v75_v45 = vxor.u32 %v67_v37, %v59_v29 }
  0x1c   :  { %v78_v36 = vxor.u32 %v70_v28, %v62_v21  ;;  %v74_v40 = vxor.u32 %v66_v32, %v58_v24  ;;  %v80_v42 = vxor.u32 %v72_v34, %v64_v26  ;;  %v85_v43 = vmul.u32 2146121005, %v77_v35 }
  0x1d   :  { %v76_v46 = vxor.u32 %v68_v38, %v60_v30  ;;  %v81_v47 = vmul.u32 2146121005, %v73_v39  ;;  %v87_v51 = vmul.u32 2146121005, %v79_v41  ;;  %v352_v28 = vmov 0.0  }
  0x1e   :  { %v86_v44 = vmul.u32 2146121005, %v78_v36  ;;  %v82_v48 = vmul.u32 2146121005, %v74_v40  ;;  %v93_v49 = vshrl.u32 %v85_v43, 15 }
  0x1f   :  { %v88_v52 = vmul.u32 2146121005, %v80_v42  ;;  %v89_v53 = vshrl.u32 %v81_v47, 15  ;;  %v83_v55 = vmul.u32 2146121005, %v75_v45  ;;  %v95_v59 = vshrl.u32 %v87_v51, 15 }
  0x20   :  { %v94_v50 = vshrl.u32 %v86_v44, 15  ;;  %v90_v54 = vshrl.u32 %v82_v48, 15  ;;  %v84_v56 = vmul.u32 2146121005, %v76_v46  ;;  %v101_v57 = vxor.u32 %v93_v49, %v85_v43  ;;  %v155_v43 = vld [vmem:[#allocation2 + $0x40] sm:$0xff]  ;;  %v157_v45 = vld [vmem:[#allocation2 + $0x50] sm:$0xff] }
  0x21   :  { %v96_v60 = vshrl.u32 %v88_v52, 15  ;;  %v97_v61 = vxor.u32 %v89_v53, %v81_v47  ;;  %v91_v63 = vshrl.u32 %v83_v55, 15  ;;  %v103_v4 = vxor.u32 %v95_v59, %v87_v51  ;;  %v158_v46 = vld [vmem:[#allocation2 + $0x58] sm:$0xff]  ;;  %v148_v51 = vld [vmem:[#allocation2 + $0x8] sm:$0xff] }
  0x22   :  { %v102_v58 = vxor.u32 %v94_v50, %v86_v44  ;;  %v98_v62 = vxor.u32 %v90_v54, %v82_v48  ;;  %v92_v0 = vshrl.u32 %v84_v56, 15  ;;  %v109_v1 = vmul.u32 2221713035, %v101_v57  ;;  %v156_v44 = vld [vmem:[#allocation2 + $0x48] sm:$0xff]  ;;  %v147_v48 = vld [vmem:[#allocation2] sm:$0xff]  ;;  %v150_v53 = vld [vmem:[#allocation2 + $0x18] sm:$0xff] }
  0x23   :  { %v104_v5 = vxor.u32 %v96_v60, %v88_v52  ;;  %v105_v6 = vmul.u32 2221713035, %v97_v61  ;;  %v99_v8 = vxor.u32 %v91_v63, %v83_v55  ;;  %v111_v12 = vmul.u32 2221713035, %v103_v4  ;;  %v149_v52 = vld [vmem:[#allocation2 + $0x10] sm:$0xff]  ;;  %v159_v60 = vld [vmem:[#allocation2 + $0x60] sm:$0xff] }
  0x24   :  { %v110_v3 = vmul.u32 2221713035, %v102_v58  ;;  %v106_v7 = vmul.u32 2221713035, %v98_v62  ;;  %v100_v9 = vxor.u32 %v92_v0, %v84_v56  ;;  %v117_v10 = vshrl.u32 %v109_v1, 16  ;;  %v160_v61 = vld [vmem:[#allocation2 + $0x68] sm:$0xff] }
  0x25   :  { %v112_v13 = vmul.u32 2221713035, %v104_v5  ;;  %v113_v14 = vshrl.u32 %v105_v6, 16  ;;  %v107_v16 = vmul.u32 2221713035, %v99_v8  ;;  %v119_v20 = vshrl.u32 %v111_v12, 16 }
  0x26   :  { %v118_v11 = vshrl.u32 %v110_v3, 16  ;;  %v114_v15 = vshrl.u32 %v106_v7, 16  ;;  %v108_v17 = vmul.u32 2221713035, %v100_v9  ;;  %v125_v18 = vxor.u32 %v117_v10, %v109_v1  ;;  %v162_v4 = vld [vmem:[#allocation2 + $0x78] sm:$0xff]  ;;  %v152_v9 = vld [vmem:[#allocation2 + $0x28] sm:$0xff] }
  0x27   :  { %v120_v21 = vshrl.u32 %v112_v13, 16  ;;  %v121_v22 = vxor.u32 %v113_v14, %v105_v6  ;;  %v115_v24 = vshrl.u32 %v107_v16, 16  ;;  %v127_v26 = vxor.u32 %v119_v20, %v111_v12  ;;  %v151_v6 = vld [vmem:[#allocation2 + $0x20] sm:$0xff]  ;;  %v153_v10 = vld [vmem:[#allocation2 + $0x30] sm:$0xff] }
  0x28   :  { %v126_v19 = vxor.u32 %v118_v11, %v110_v3  ;;  %v122_v23 = vxor.u32 %v114_v15, %v106_v7  ;;  %v116_v25 = vshrl.u32 %v108_v17, 16  ;;  %vm135_vm1 = vcmp.lt.u32.totalorder %v125_v18, 429496729  ;;  %v161_v3 = vld [vmem:[#allocation2 + $0x70] sm:$0xff]  ;;  %v154_v11 = vld [vmem:[#allocation2 + $0x38] sm:$0xff] }
  0x29   :  { %v128_v27 = vxor.u32 %v120_v21, %v112_v13  ;;  %vm143_vm3 = vmor %vm129_vm0, %vm135_vm1  ;;  %vm131_vm4 = vcmp.lt.u32.totalorder %v121_v22, 429496729  ;;  %v123_v30 = vxor.u32 %v115_v24, %v107_v16  ;;  %vm137_vm7 = vcmp.lt.u32.totalorder %v127_v26, 429496729 }
  0x2a   :  { %vm136_vm2 = vcmp.lt.u32.totalorder %v126_v19, 429496729  ;;  %vm132_vm5 = vcmp.lt.u32.totalorder %v122_v23, 429496729  ;;  %v272_v31 = vsel %vm143_vm3, 1.0, %v352_v28  ;;  %vm139_vm6 = vmor %vm129_vm0, %vm131_vm4  ;;  %v124_v36 = vxor.u32 %v116_v25, %v108_v17 }
  0x2b   :  { %v273_v29 = vsel %vm136_vm2, 1.0, %v352_v28  ;;  %v269_v32 = vsel %vm132_vm5, 1.0, %v352_v28  ;;  %vm138_vm8 = vcmp.lt.u32.totalorder %v128_v27, 429496729  ;;  %v268_v34 = vsel %vm139_vm6, 1.0, %v352_v28  ;;  %vm145_vm9 = vmor %vm129_vm0, %vm137_vm7 }
  0x2c   :  { %v294_v33 = vpack.i.bf16 %v273_v29, %v272_v31  ;;  %v275_v35 = vsel %vm138_vm8, 1.0, %v352_v28  ;;  %v283_v37 = vpack.i.bf16 %v269_v32, %v268_v34  ;;  %v274_v38 = vsel %vm145_vm9, 1.0, %v352_v28 }
  0x2d   :  { %vm133_vm10 = vcmp.lt.u32.totalorder %v123_v30, 429496729  ;;  %v299_v39 = vpack.i.bf16 %v275_v35, %v274_v38  ;;  %vm134_vm11 = vcmp.lt.u32.totalorder %v124_v36, 429496729 }
  0x2e   :  { %295 = vperm.xlu1 %293, %v294_v33   ;;  %vm141_vm12 = vmor %vm129_vm0, %vm133_vm10  ;;  %284 = vperm.xlu0 %282, %v283_v37   ;;  %v271_v41 = vsel %vm134_vm11, 1.0, %v352_v28 }
  0x2f   :  { %v270_v40 = vsel %vm141_vm12, 1.0, %v352_v28 }
  0x30   :  { %v288_v42 = vpack.i.bf16 %v271_v41, %v270_v40 }
  0x32   :  { %300 = vperm.xlu1 %293, %v299_v39   ;;  %289 = vperm.xlu0 %282, %v288_v42  }
  0xa9   :  { %v296_v47 = vpop.permute.xlu1 %295  ;;  %v285_v54 = vpop.permute.xlu0 %284 }
  0xaa   :  { %v298_v49 = vunpack.i.h.bf16 %v296_v47  ;;  %v297_v50 = vunpack.i.l.bf16 %v296_v47  ;;  %v287_v2 = vunpack.i.h.bf16 %v285_v54  ;;  %v286_v55 = vunpack.i.l.bf16 %v285_v54 }
  0xac   :  { %v229_v56 = vmul.f32 %v298_v49, %v157_v45  ;;  %v230_v57 = vmul.f32 %v298_v49, %v158_v46  ;;  %v227_v58 = vmul.f32 %v297_v50, %v155_v43  ;;  %v228_v59 = vmul.f32 %v297_v50, %v156_v44 }
  0xad   :  { %v221_v62 = vmul.f32 %v287_v2, %v149_v52  ;;  %v222_v63 = vmul.f32 %v287_v2, %v150_v53  ;;  %v219_v0 = vmul.f32 %v286_v55, %v147_v48  ;;  %v220_v1 = vmul.f32 %v286_v55, %v148_v51  ;;  %v301_v5 = vpop.permute.xlu1 %300  ;;  %v290_v12 = vpop.permute.xlu0 %289 }
  0xae   :  { %245 = vst [vmem:[#allocation5 + $0x50] sm:$0xff] %v229_v56  ;;  %246 = vst [vmem:[#allocation5 + $0x58] sm:$0xff] %v230_v57  ;;  %v303_v7 = vunpack.i.h.bf16 %v301_v5  ;;  %v302_v8 = vunpack.i.l.bf16 %v301_v5  ;;  %v292_v13 = vunpack.i.h.bf16 %v290_v12  ;;  %v291_v14 = vunpack.i.l.bf16 %v290_v12 }
  0xaf   :  { %243 = vst [vmem:[#allocation5 + $0x40] sm:$0xff] %v227_v58  ;;  %244 = vst [vmem:[#allocation5 + $0x48] sm:$0xff] %v228_v59 }
  0xb0   :  { %237 = vst [vmem:[#allocation5 + $0x10] sm:$0xff] %v221_v62  ;;  %238 = vst [vmem:[#allocation5 + $0x18] sm:$0xff] %v222_v63  ;;  %v233_v15 = vmul.f32 %v303_v7, %v161_v3  ;;  %v234_v16 = vmul.f32 %v303_v7, %v162_v4  ;;  %v231_v17 = vmul.f32 %v302_v8, %v159_v60 }
  0xb1   :  { %235 = vst [vmem:[#allocation5] sm:$0xff] %v219_v0  ;;  %236 = vst [vmem:[#allocation5 + $0x8] sm:$0xff] %v220_v1  ;;  %v232_v18 = vmul.f32 %v302_v8, %v160_v61  ;;  %v225_v19 = vmul.f32 %v292_v13, %v153_v10  ;;  %v226_v20 = vmul.f32 %v292_v13, %v154_v11 }
  0xb2   :  { %v223_v21 = vmul.f32 %v291_v14, %v151_v6  ;;  %v224_v22 = vmul.f32 %v291_v14, %v152_v9  ;;  %249 = vst [vmem:[#allocation5 + $0x70] sm:$0xff] %v233_v15  ;;  %250 = vst [vmem:[#allocation5 + $0x78] sm:$0xff] %v234_v16 }
  0xb3   :  { %247 = vst [vmem:[#allocation5 + $0x60] sm:$0xff] %v231_v17  ;;  %248 = vst [vmem:[#allocation5 + $0x68] sm:$0xff] %v232_v18 }
  0xb4   :  { %241 = vst [vmem:[#allocation5 + $0x30] sm:$0xff] %v225_v19  ;;  %242 = vst [vmem:[#allocation5 + $0x38] sm:$0xff] %v226_v20 }
  0xb5   :  { %239 = vst [vmem:[#allocation5 + $0x20] sm:$0xff] %v223_v21  ;;  %240 = vst [vmem:[#allocation5 + $0x28] sm:$0xff] %v224_v22 }
  0xb6   :  { %335 = shalt.err (!%p332_p9)
}
  0xb7   :  { %262 = dma.vmem_to_hbm [thread:$0]  %s257_s23, 2048, %s409_s2, [#allocation4], %s349_s12, %s349_s12, %s350_s13  }
  0xb8   :  { %346 = dma.done.wait [#allocation4], 2048  }
  0xb9   :  { %347 = vsyncadd [#allocation4], 4294965248 }
  0xba   :  { %266 = vsyncpa [#allocation3], 1 }
  0xbb   :  { %267 = vsyncpa [#allocation4], 1 }

</bundles_post_ra>
